<compile_context>
chip_gen: v6e
topology: v6e:2x2x1
jax: 0.10.0
libtpu: 0.0.40
codegen_flags: <defaults>
</compile_context>

<pallas_src>
import functools
import math

import jax
import jax.numpy as jnp
from jax.experimental import pallas as pl
from jax.experimental.pallas import tpu as pltpu


def make_positional_encoding_buffer(d_model, max_len=5000, dtype=jnp.float32):
    """Build the `pe` buffer exactly as the PyTorch __init__ does, as (max_len, d_model)."""
    position = jnp.arange(0, max_len, dtype=jnp.float32)[:, None]             # (max_len, 1)
    div_term = jnp.exp(
        jnp.arange(0, d_model, 2, dtype=jnp.float32) * (-math.log(10000.0) / d_model)
    )                                                                          # (ceil(D/2),)
    angles = position * div_term                                               # (max_len, ceil(D/2))
    pe = jnp.zeros((max_len, d_model), jnp.float32)
    pe = pe.at[:, 0::2].set(jnp.sin(angles))
    pe = pe.at[:, 1::2].set(jnp.cos(angles)[:, : d_model // 2])                # odd d_model safe
    return pe.astype(dtype)                                                    # (max_len, d_model)


def _pe_add_kernel(x_ref, pe_ref, o_ref, *, batch):
    # x_ref / o_ref: (ts, B*D) lane-dense blocks; pe_ref: (ts, D).
    # Broadcasting pe over the batch in the flattened layout == tiling it B
    # times along lanes.  Pure VPU add; vreg copies hide under the HBM DMA.
    pe = pe_ref[...]
    if batch == 1:
        o_ref[...] = x_ref[...] + pe
    else:
        o_ref[...] = x_ref[...] + jnp.tile(pe, (1, batch))


def _round_up(a, b):
    return ((a + b - 1) // b) * b


def _chip_params():
    """(vmem_budget_bytes, target_block_bytes, vmem_limit_bytes) per TPU generation."""
    kind = ""
    try:
        kind = jax.devices()[0].device_kind.lower()
    except Exception:  # pragma: no cover - defensive
        pass
    if "v5 lite" in kind or "v5e" in kind or "v5lite" in kind:
        return 12 << 20, 2 << 20, 16 << 20           # 16 MiB scoped default, 128 MiB physical
    if "v6" in kind:
        return 48 << 20, 6 << 20, 64 << 20           # 32/128 MiB -> raise limit, bigger blocks
    if "v7" in kind:
        return 40 << 20, 6 << 20, 48 << 20           # 64 MiB physical -> leave headroom
    return 12 << 20, 2 << 20, 32 << 20               # unknown: conservative, safe everywhere


def _choose_tile_s(S, bd_row_bytes, pe_row_bytes, sublane, *,
                   target_block_bytes, vmem_budget_bytes, min_grid_steps=2):
    """Pick the sequence tile (sublane dim of the 2D blocks)."""
    if S <= sublane:
        return int(S)                                 # full-dim block (always legal)
    # True double-buffered working set per sequence row: x-in, out, pe blocks.
    per_row = 2 * (2 * bd_row_bytes + pe_row_bytes)
    ts = max(sublane, target_block_bytes // max(1, bd_row_bytes))
    ts = min(ts, max(sublane, vmem_budget_bytes // max(1, per_row)))
    # Keep >= min_grid_steps grid iterations: v7x's two TensorCores both stream
    # HBM and the DMA/compute pipeline actually overlaps.
    ts = min(ts, max(sublane, pl.cdiv(S, min_grid_steps)))
    ts = min(ts, S)
    ts = max(sublane, (ts // sublane) * sublane)      # sublane-aligned -> unmasked ld/st
    if S % ts:                                        # prefer ts | S: no masked tail block
        for cand in range(ts, sublane - 1, -sublane):
            if S % cand == 0:
                ts = cand
                break
    return int(ts)


def positional_encoding(x, pe, *, target_block_bytes=None, donate_x=False):
    """x + pe[:x.shape[0]] with the broadcast add in a tiled, pipelined Pallas kernel."""
    S, B, D = x.shape

    # Accept both the PyTorch buffer layout (max_len, 1, D) and the 2D (max_len, D).
    if pe.ndim == 3:
        assert pe.shape[1] == 1 and pe.shape[2] == D
        pe2d = pe.reshape(pe.shape[0], D)
    else:
        assert pe.ndim == 2 and pe.shape[1] == D
        pe2d = pe
    assert pe2d.shape[0] >= S, "max_len of the pe buffer must be >= seq_len"
    if pe2d.dtype != x.dtype:
        pe2d = pe2d.astype(x.dtype)                   # one-time cast outside the kernel

    vmem_budget, default_block, vmem_limit = _chip_params()
    if target_block_bytes is None:
        target_block_bytes = default_block

    itemsize = jnp.dtype(x.dtype).itemsize
    sublane = {1: 32, 2: 16, 4: 8}.get(itemsize, 8)
    bd_row_bytes = _round_up(B * D, 128) * itemsize    # lane-padded x/out row
    pe_row_bytes = _round_up(D, 128) * itemsize        # lane-padded pe row
    ts = _choose_tile_s(S, bd_row_bytes, pe_row_bytes, sublane,
                        target_block_bytes=target_block_bytes,
                        vmem_budget_bytes=vmem_budget)
    grid = (pl.cdiv(S, ts),)

    # Free row-major collapse of (S, B, D) -> (S, B*D): lane-dense blocks.
    x2d = x.reshape(S, B * D)

    extra = {}
    if donate_x:
        extra["input_output_aliases"] = {0: 0}        # reuse x's HBM buffer for the output

    out2d = pl.pallas_call(
        functools.partial(_pe_add_kernel, batch=B),
        out_shape=jax.ShapeDtypeStruct((S, B * D), x.dtype),
        grid=grid,
        in_specs=[
            pl.BlockSpec((ts, B * D), lambda i: (i, 0)),
            # index_map pulls rows [i*ts, (i+1)*ts) straight from the full
            # (max_len, D) buffer -- no wrapper-side slice, no extra HBM copy.
            pl.BlockSpec((ts, D), lambda i: (i, 0)),
        ],
        out_specs=pl.BlockSpec((ts, B * D), lambda i: (i, 0)),
        compiler_params=pltpu.CompilerParams(
            dimension_semantics=("parallel",),
            vmem_limit_bytes=vmem_limit,
        ),
        **extra,
    )(x2d, pe2d)

    return out2d.reshape(S, B, D)


if __name__ == "__main__":
    # --- small toy shape consistent with the module: seq=8, batch=2, d_model=32 ---
    S, B, D = 8, 2, 32
    MAX_LEN = 64  # module default is 5000; small buffer here

    key = jax.random.PRNGKey(0)
    x = jax.random.normal(key, (S, B, D), dtype=jnp.float32)
    pe = make_positional_encoding_buffer(D, max_len=MAX_LEN, dtype=jnp.float32)

    out = jax.block_until_ready(positional_encoding(x, pe))
    ref = x + pe[:S][:, None, :]
    assert out.shape == (S, B, D)
    assert jnp.allclose(out, ref, atol=1e-6, rtol=1e-6)

    # --- second check: multi-block grid + lane-dense (B*D % 128 == 0) path ---
    S2, B2, D2 = 512, 4, 128
    x2 = jax.random.normal(jax.random.PRNGKey(1), (S2, B2, D2), dtype=jnp.float32)
    pe2 = make_positional_encoding_buffer(D2, max_len=640, dtype=jnp.float32)
    # Small target block -> ts=128, grid=(4,)
    out2 = jax.block_until_ready(
        positional_encoding(x2, pe2, target_block_bytes=256 << 10)
    )
    ref2 = x2 + pe2[:S2][:, None, :]
    assert out2.shape == (S2, B2, D2)
    assert jnp.allclose(out2, ref2, atol=1e-6, rtol=1e-6)

    # --- third check: donated-input (in-place style) path ---
    out3 = jax.block_until_ready(positional_encoding(x2, pe2, donate_x=True))
    assert jnp.allclose(out3, ref2, atol=1e-6, rtol=1e-6)

    print("KERNEL_OK")
</pallas_src>

<mosaic_0001>
module attributes {stable_mosaic.version = 11 : i64} {
  func.func @_pe_add_kernel(%arg0: i32, %arg1: memref<8x64xf32, #tpu.memory_space<vmem>>, %arg2: memref<8x32xf32, #tpu.memory_space<vmem>>, %arg3: memref<8x64xf32, #tpu.memory_space<vmem>>) attributes {dimension_semantics = [#tpu.dimension_semantics<parallel>], iteration_bounds = array<i64: 1>, scalar_prefetch = 0 : i64, scratch_operands = 0 : i64, tpu.core_type = #tpu.core_type<tc>, window_params = [{transform_indices = @transform_0, window_bounds = array<i64: 8, 64>}, {transform_indices = @transform_1, window_bounds = array<i64: 8, 32>}, {transform_indices = @transform_2, window_bounds = array<i64: 8, 64>}]} {
    %c0 = arith.constant 0 : index
    %c0_0 = arith.constant 0 : index
    %0 = vector.load %arg2[%c0, %c0_0] : memref<8x32xf32, #tpu.memory_space<vmem>>, vector<8x32xf32>
    %c0_1 = arith.constant 0 : index
    %c0_2 = arith.constant 0 : index
    %1 = vector.load %arg1[%c0_1, %c0_2] : memref<8x64xf32, #tpu.memory_space<vmem>>, vector<8x64xf32>
    %2 = tpu.concatenate %0, %0 in 1 : vector<8x32xf32>, vector<8x32xf32> -> vector<8x64xf32>
    %3 = arith.addf %1, %2 : vector<8x64xf32>
    %c0_3 = arith.constant 0 : index
    %c0_4 = arith.constant 0 : index
    %4 = vector.load %arg3[%c0_3, %c0_4] : memref<8x64xf32, #tpu.memory_space<vmem>>, vector<8x64xf32>
    tpu.vector_store %arg3[%c0_3, %c0_4], %3 {strides = array<i32>} : memref<8x64xf32, #tpu.memory_space<vmem>>, vector<8x64xf32>,
    return
  }
  func.func @transform_0(%arg0: i32) -> (i32, i32) {
    %c0_i32 = arith.constant 0 : i32
    %c0_i32_0 = arith.constant 0 : i32
    return %arg0, %c0_i32 : i32, i32
  }
  func.func @transform_1(%arg0: i32) -> (i32, i32) {
    %c0_i32 = arith.constant 0 : i32
    %c0_i32_0 = arith.constant 0 : i32
    return %arg0, %c0_i32 : i32, i32
  }
  func.func @transform_2(%arg0: i32) -> (i32, i32) {
    %c0_i32 = arith.constant 0 : i32
    %c0_i32_0 = arith.constant 0 : i32
    return %arg0, %c0_i32 : i32, i32
  }
}

</mosaic_0001>

<bundles_post_ra>
// kernel: tpu_custom_call.1
= control target key start
LH: loop header
LB: loop body
LE: loop exit
PB: predicated region body
PF: predicated region fallthrough
CT: control target
= control target key end

     0   :  { %s87_s0 = inlined_call_operand.vmem [shape: f32[8,64], index: 0, kind: input, shape index: {}]   ;;  %s88_s1 = inlined_call_operand.vmem [shape: f32[64,32], index: 1, kind: input, shape index: {}]   ;;  %s89_s2 = inlined_call_operand.hbm [shape: f32[8,64], index: 2, kind: output, shape index: {}]  }
   0x1   :  { %v12_v0 = vld [vmem:[%s88_s1] sm:$0xff] }
   0x2   :  { %7 = vsyncpa [#allocation3], 0  ;;  %s61_s11 = smov 32   ;;  %vm18_vm0 = vcmask 261120   ;;  %v13_v1 = vld [vmem:[%s87_s0] sm:$0xff]  ;;  %s62_s14 = smov [#allocation2]  }
   0x3   :  { %15 = vrot.lane.b32.xlu0 %v12_v0, %s61_s11  ;;  %s29_s15 = sshll.u32 %s62_s14, 4  ;;  %vm21_vm1 = vcmask 523264   ;;  %s30_s15 = int_to_ptr.vmem [resolvable:$true] %s29_s15 }
   0x4   :  { %s39_s16 = scalar_lea.vmem %s30_s15, 128  ;;  %p44_p1 = scmp.lt.s32.totalorder %s30_s15, %s30_s15 }
   0x5   :  { %p40_p0 = scmp.ne.s32.totalorder %s30_s15, %s39_s16  ;;  %p45_p2 = scmp.lt.s32.totalorder %s39_s16, %s39_s16 }
   0x7   :  { %p46_p3 = por %p45_p2, %p44_p1 }
   0x9   :  { %p47_p4 = pnand %p46_p3, %p40_p0 }
  0x75   :  { %v16_v2 = vpop.permute.xlu0 %15 }
  0x76   :  { %v19_v3 = vsel %vm18_vm0, %v12_v0, %v16_v2 }
  0x77   :  { %v20_v4 = vadd.f32 %v19_v3, %v13_v1 }
  0x79   :  { %22 = vst.msk [vmem:[#allocation2] sm:$0xff] %vm21_vm1, %v20_v4 }
  0x7a   :  { %50 = shalt.err (!%p47_p4)
}
  0x7b   :  { %32 = dma.vmem_to_hbm [thread:$0]  %s30_s15, 128, %s89_s2, [#allocation3]  }
  0x7c   :  { %59 = dma.done.wait [#allocation3], 128  }
  0x7d   :  { %60 = vsyncadd [#allocation3], 4294967168 }
  0x7e   :  { %36 = vsyncpa [#allocation3], 1 }

</bundles_post_ra>
